<compile_context>
chip_gen: v6e
topology: v6e:2x2x1
jax: 0.10.0
libtpu: 0.0.40
codegen_flags: <defaults>
</compile_context>

<pallas_src>
import jax
import jax.numpy as jnp
from jax import lax
from jax.experimental import pallas as pl
from jax.experimental.pallas import tpu as pltpu


def _round_up(n, m):
    return ((n + m - 1) // m) * m


def _vmem_capacity_bytes():
    try:
        return int(pltpu.get_tpu_info().vmem_capacity_bytes)
    except Exception:
        return 64 * (1 << 20)  # conservative fallback (v7x per-TC VMEM)


def _vmem_estimate_bytes(ct, bp, ip, hp, op):
    # Double-buffered weights/biases + double-buffered x/out/hs slabs + scratch.
    weights = 2 * 4 * (ip * hp + hp * hp + hp * op + hp + op + hp)
    slabs = 2 * 4 * ct * bp * (ip + op + hp)
    scratch = 4 * (bp * hp + ct * bp * hp)
    return weights + slabs + scratch


def _pick_time_chunk(T, bp, ip, hp, op, vmem_budget_bytes):
    # Largest CT (divisor of T) that fits the VMEM budget, capped so that at least
    # ~3 chunks are in flight when T allows (overlaps DMA with the recurrence).
    fixed = 2 * 4 * (ip * hp + hp * hp + hp * op + hp + op + hp) + 4 * bp * hp
    per_step = 4 * bp * (2 * ip + 2 * op + 2 * hp + hp)
    budget_ct = max(1, (vmem_budget_bytes - fixed) // max(1, per_step))
    pipeline_cap = max(1, T // 3) if T >= 3 else T
    cap = max(1, min(int(budget_ct), pipeline_cap, T))
    for c in range(cap, 0, -1):
        if T % c == 0:
            return c
    return 1


def _make_rnn_kernel(chunk_t, bp):
    unroll = max(1, min(8, chunk_t))

    def kernel(x_ref, h0_ref, wI_ref, wR_ref, wO_ref, bR_ref, bO_ref,
               out_ref, hs_ref, h_scratch, xI_scratch):
        # Initialize the carried hidden state from h0 on the first time chunk.
        @pl.when(pl.program_id(0) == 0)
        def _():
            h_scratch[...] = jnp.broadcast_to(h0_ref[...], h_scratch.shape)

        # Hoisted input projection: one MXU op for the whole chunk, staged in VMEM.
        xI_scratch[...] = (jnp.dot(x_ref[...], wI_ref[...],
                                   preferred_element_type=jnp.float32)
                           + bR_ref[...])                      # (CT*Bp, Hp)

        wR = wR_ref[...]                                       # (Hp, Hp), resident

        # Serial recurrence: single (Bp,Hp) carry, per-step tile-aligned store
        # into the hs output slab (no list / concat).
        def step(t, h):
            row = pl.multiple_of(t * bp, bp)
            pre = xI_scratch[pl.ds(row, bp), :] + jnp.dot(
                h, wR, preferred_element_type=jnp.float32)
            h_new = jnp.tanh(pre)
            hs_ref[pl.ds(row, bp), :] = h_new
            return h_new

        h_final = lax.fori_loop(0, chunk_t, step, h_scratch[...], unroll=unroll)
        h_scratch[...] = h_final                               # carry to next chunk

        # Hoisted output projection over the whole slab + bulk lane-dense writeback.
        out_ref[...] = (jnp.dot(hs_ref[...], wO_ref[...],
                                preferred_element_type=jnp.float32)
                        + bO_ref[...]).astype(out_ref.dtype)

    return kernel


def net2_forward(x, h0, wI, wR, wO, bR, bO):
    """x: (T, B, I) float32. Returns (outputs (T,B,O), hidden_states (T,B,H))."""
    T, B, I = x.shape
    H = wR.shape[0]
    O = wO.shape[0]

    # Pad to (8, 128) tile granularity.
    Bp = _round_up(B, 8)
    Ip = _round_up(I, 128)
    Hp = _round_up(H, 128)
    Op = _round_up(O, 128)

    vmem_cap = _vmem_capacity_bytes()
    CT = _pick_time_chunk(T, Bp, Ip, Hp, Op, int(0.75 * vmem_cap))
    n_chunks = T // CT

    f32 = jnp.float32
    # Zero-padded operands (padded lanes stay exactly 0 through the recurrence).
    x_p = jnp.zeros((T, Bp, Ip), f32).at[:, :B, :I].set(x.astype(f32))
    x2 = x_p.reshape(T * Bp, Ip)
    h0_p = jnp.zeros((1, Hp), f32).at[0, :H].set(h0.astype(f32))
    wI_T = jnp.zeros((Ip, Hp), f32).at[:I, :H].set(wI.T.astype(f32))   # (Ip, Hp)
    wR_p = jnp.zeros((Hp, Hp), f32).at[:H, :H].set(wR.astype(f32))     # (Hp, Hp)
    wO_T = jnp.zeros((Hp, Op), f32).at[:H, :O].set(wO.T.astype(f32))   # (Hp, Op)
    bR_p = jnp.zeros((1, Hp), f32).at[0, :H].set(bR.astype(f32))
    bO_p = jnp.zeros((1, Op), f32).at[0, :O].set(bO.astype(f32))

    est = _vmem_estimate_bytes(CT, Bp, Ip, Hp, Op)
    vmem_limit = int(min(0.9 * vmem_cap, max(32 * (1 << 20), 2 * est)))

    grid_spec = pltpu.PrefetchScalarGridSpec(
        num_scalar_prefetch=0,
        grid=(n_chunks,),
        in_specs=[
            pl.BlockSpec((CT * Bp, Ip), lambda c: (c, 0)),   # x time-chunk slab
            pl.BlockSpec((1, Hp), lambda c: (0, 0)),         # h0 row (broadcast in-kernel)
            pl.BlockSpec((Ip, Hp), lambda c: (0, 0)),        # wI^T (resident)
            pl.BlockSpec((Hp, Hp), lambda c: (0, 0)),        # wR   (resident)
            pl.BlockSpec((Hp, Op), lambda c: (0, 0)),        # wO^T (resident)
            pl.BlockSpec((1, Hp), lambda c: (0, 0)),         # bR
            pl.BlockSpec((1, Op), lambda c: (0, 0)),         # bO
        ],
        out_specs=[
            pl.BlockSpec((CT * Bp, Op), lambda c: (c, 0)),   # outputs slab
            pl.BlockSpec((CT * Bp, Hp), lambda c: (c, 0)),   # hidden-state slab
        ],
        scratch_shapes=[
            pltpu.VMEM((Bp, Hp), jnp.float32),               # carried hidden state
            pltpu.VMEM((CT * Bp, Hp), jnp.float32),          # staged xI chunk
        ],
    )

    out2, hs2 = pl.pallas_call(
        _make_rnn_kernel(CT, Bp),
        out_shape=(jax.ShapeDtypeStruct((T * Bp, Op), jnp.float32),
                   jax.ShapeDtypeStruct((T * Bp, Hp), jnp.float32)),
        grid_spec=grid_spec,
        compiler_params=pltpu.CompilerParams(
            dimension_semantics=("arbitrary",),   # time chunks carry state -> sequential
            vmem_limit_bytes=vmem_limit),
    )(x2, h0_p, wI_T, wR_p, wO_T, bR_p, bO_p)

    outputs = out2.reshape(T, Bp, Op)[:, :B, :O]
    hidden_states = hs2.reshape(T, Bp, Hp)[:, :B, :H]
    return outputs, hidden_states


def init_params(key, input_size, hidden_size, output_size, gain=0.85):
    # Mirrors net2.initialize_parameters (deterministic, synthetic).
    hscale = 0.1
    ifactor = gain / jnp.sqrt(jnp.float32(input_size))
    hfactor = gain / jnp.sqrt(jnp.float32(hidden_size))
    pfactor = gain / jnp.sqrt(jnp.float32(hidden_size))
    k0, k1, k2, k3 = jax.random.split(key, 4)
    h0 = jax.random.normal(k0, (hidden_size,), jnp.float32) * hscale
    wI = jax.random.normal(k1, (hidden_size, input_size), jnp.float32) * ifactor
    wR = jax.random.normal(k2, (hidden_size, hidden_size), jnp.float32) * hfactor
    wO = jax.random.normal(k3, (output_size, hidden_size), jnp.float32) * pfactor
    bR = jnp.zeros((hidden_size,), jnp.float32)
    bO = jnp.zeros((output_size,), jnp.float32)
    return h0, wI, wR, wO, bR, bO


def reference_forward(x, h0, wI, wR, wO, bR, bO):
    # Pure-JAX reference (semantics of net2.forward) for sanity checking.
    B = x.shape[1]
    h_init = jnp.broadcast_to(h0[None, :], (B, h0.shape[0]))

    def step(h, x_t):
        h_new = jnp.tanh(x_t @ wI.T + bR + h @ wR)
        o_t = h_new @ wO.T + bO
        return h_new, (o_t, h_new)

    _, (outs, hs) = jax.lax.scan(step, h_init, x)
    return outs, hs


if __name__ == "__main__":
    # net2(input_size=4, hidden_size=32, output_size=8, dt=10)
    T, B, I, H, O = 8, 2, 4, 32, 8
    key = jax.random.PRNGKey(0)
    kp, kx = jax.random.split(key)
    h0, wI, wR, wO, bR, bO = init_params(kp, I, H, O)
    x = jax.random.normal(kx, (T, B, I), jnp.float32)

    outputs, hidden_states = net2_forward(x, h0, wI, wR, wO, bR, bO)
    jax.block_until_ready((outputs, hidden_states))

    ref_out, ref_hs = reference_forward(x, h0, wI, wR, wO, bR, bO)
    assert outputs.shape == (T, B, O) and hidden_states.shape == (T, B, H)
    assert jnp.allclose(outputs, ref_out, atol=1e-5, rtol=1e-5)
    assert jnp.allclose(hidden_states, ref_hs, atol=1e-5, rtol=1e-5)

    print("KERNEL_OK")
</pallas_src>

<mosaic_0001>
module attributes {stable_mosaic.version = 11 : i64} {
  func.func @kernel(%arg0: i32, %arg1: memref<16x128xf32, #tpu.memory_space<vmem>>, %arg2: memref<1x128xf32, #tpu.memory_space<vmem>>, %arg3: memref<128x128xf32, #tpu.memory_space<vmem>>, %arg4: memref<128x128xf32, #tpu.memory_space<vmem>>, %arg5: memref<128x128xf32, #tpu.memory_space<vmem>>, %arg6: memref<1x128xf32, #tpu.memory_space<vmem>>, %arg7: memref<1x128xf32, #tpu.memory_space<vmem>>, %arg8: memref<16x128xf32, #tpu.memory_space<vmem>>, %arg9: memref<16x128xf32, #tpu.memory_space<vmem>>, %arg10: memref<8x128xf32, #tpu.memory_space<vmem>>, %arg11: memref<16x128xf32, #tpu.memory_space<vmem>>) attributes {dimension_semantics = [#tpu.dimension_semantics<arbitrary>], iteration_bounds = array<i64: 4>, scalar_prefetch = 0 : i64, scratch_operands = 2 : i64, tpu.core_type = #tpu.core_type<tc>, window_params = [{transform_indices = @transform_0, window_bounds = array<i64: 16, 128>}, {pipeline_mode = #tpu.pipeline_mode<synchronous>, transform_indices = @transform_1, window_bounds = array<i64: 1, 128>}, {pipeline_mode = #tpu.pipeline_mode<synchronous>, transform_indices = @transform_2, window_bounds = array<i64: 128, 128>}, {pipeline_mode = #tpu.pipeline_mode<synchronous>, transform_indices = @transform_3, window_bounds = array<i64: 128, 128>}, {pipeline_mode = #tpu.pipeline_mode<synchronous>, transform_indices = @transform_4, window_bounds = array<i64: 128, 128>}, {pipeline_mode = #tpu.pipeline_mode<synchronous>, transform_indices = @transform_5, window_bounds = array<i64: 1, 128>}, {pipeline_mode = #tpu.pipeline_mode<synchronous>, transform_indices = @transform_6, window_bounds = array<i64: 1, 128>}, {transform_indices = @transform_7, window_bounds = array<i64: 16, 128>}, {transform_indices = @transform_8, window_bounds = array<i64: 16, 128>}]} {
    %c0_i32 = arith.constant 0 : i32
    %0 = arith.cmpi eq, %arg0, %c0_i32 : i32
    %1 = arith.extui %0 : i1 to i32
    %c0_i32_0 = arith.constant 0 : i32
    %2 = arith.cmpi ne, %1, %c0_i32_0 : i32
    scf.if %2 {
      %c0_31 = arith.constant 0 : index
      %c0_32 = arith.constant 0 : index
      %38 = vector.load %arg2[%c0_31, %c0_32] : memref<1x128xf32, #tpu.memory_space<vmem>>, vector<1x128xf32>
      %39 = vector.shape_cast %38 : vector<1x128xf32> to vector<1x128xf32>
      %40 = vector.broadcast %39 : vector<1x128xf32> to vector<8x128xf32>
      %c0_33 = arith.constant 0 : index
      %c0_34 = arith.constant 0 : index
      %41 = vector.load %arg10[%c0_33, %c0_34] : memref<8x128xf32, #tpu.memory_space<vmem>>, vector<8x128xf32>
      tpu.vector_store %arg10[%c0_33, %c0_34], %40 {strides = array<i32>} : memref<8x128xf32, #tpu.memory_space<vmem>>, vector<8x128xf32>,
    } else {
    }
    %c0 = arith.constant 0 : index
    %c0_1 = arith.constant 0 : index
    %3 = vector.load %arg1[%c0, %c0_1] : memref<16x128xf32, #tpu.memory_space<vmem>>, vector<16x128xf32>
    %c0_2 = arith.constant 0 : index
    %c0_3 = arith.constant 0 : index
    %4 = vector.load %arg3[%c0_2, %c0_3] : memref<128x128xf32, #tpu.memory_space<vmem>>, vector<128x128xf32>
    %cst = arith.constant dense<0.000000e+00> : vector<16x128xf32>
    %5 = tpu.matmul %3, %4, %cst {dimension_numbers = #tpu.dot_dimension_numbers<[1], [0], [0], [1], [0, 0, 1, 1], [], []>} : vector<16x128xf32>, vector<128x128xf32>, vector<16x128xf32> -> vector<16x128xf32>
    %c0_4 = arith.constant 0 : index
    %c0_5 = arith.constant 0 : index
    %6 = vector.load %arg6[%c0_4, %c0_5] : memref<1x128xf32, #tpu.memory_space<vmem>>, vector<1x128xf32>
    %7 = vector.broadcast %6 : vector<1x128xf32> to vector<16x128xf32>
    %8 = arith.addf %5, %7 : vector<16x128xf32>
    %c0_6 = arith.constant 0 : index
    %c0_7 = arith.constant 0 : index
    %9 = vector.load %arg11[%c0_6, %c0_7] : memref<16x128xf32, #tpu.memory_space<vmem>>, vector<16x128xf32>
    tpu.vector_store %arg11[%c0_6, %c0_7], %8 {strides = array<i32>} : memref<16x128xf32, #tpu.memory_space<vmem>>, vector<16x128xf32>,
    %c0_8 = arith.constant 0 : index
    %c0_9 = arith.constant 0 : index
    %10 = vector.load %arg4[%c0_8, %c0_9] : memref<128x128xf32, #tpu.memory_space<vmem>>, vector<128x128xf32>
    %c0_10 = arith.constant 0 : index
    %c0_11 = arith.constant 0 : index
    %11 = vector.load %arg10[%c0_10, %c0_11] : memref<8x128xf32, #tpu.memory_space<vmem>>, vector<8x128xf32>
    %c0_i32_12 = arith.constant 0 : i32
    %c8_i32 = arith.constant 8 : i32
    %12 = arith.muli %c0_i32_12, %c8_i32 : i32
    %13 = tpu.assume_multiple %12, 8 : i32
    %14 = arith.index_cast %13 : i32 to index
    %c0_13 = arith.constant 0 : index
    %15 = vector.load %arg11[%14, %c0_13] : memref<16x128xf32, #tpu.memory_space<vmem>>, vector<8x128xf32>
    %cst_14 = arith.constant dense<0.000000e+00> : vector<8x128xf32>
    %16 = tpu.matmul %11, %10, %cst_14 {dimension_numbers = #tpu.dot_dimension_numbers<[1], [0], [0], [1], [0, 0, 1, 1], [], []>} : vector<8x128xf32>, vector<128x128xf32>, vector<8x128xf32> -> vector<8x128xf32>
    %17 = arith.addf %15, %16 : vector<8x128xf32>
    %18 = math.tanh %17 : vector<8x128xf32>
    %19 = arith.index_cast %13 : i32 to index
    %c0_15 = arith.constant 0 : index
    %20 = vector.load %arg9[%19, %c0_15] : memref<16x128xf32, #tpu.memory_space<vmem>>, vector<8x128xf32>
    tpu.vector_store %arg9[%19, %c0_15], %18 {strides = array<i32>} : memref<16x128xf32, #tpu.memory_space<vmem>>, vector<8x128xf32>,
    %c1_i32 = arith.constant 1 : i32
    %c8_i32_16 = arith.constant 8 : i32
    %21 = arith.muli %c1_i32, %c8_i32_16 : i32
    %22 = tpu.assume_multiple %21, 8 : i32
    %23 = arith.index_cast %22 : i32 to index
    %c0_17 = arith.constant 0 : index
    %24 = vector.load %arg11[%23, %c0_17] : memref<16x128xf32, #tpu.memory_space<vmem>>, vector<8x128xf32>
    %cst_18 = arith.constant dense<0.000000e+00> : vector<8x128xf32>
    %25 = tpu.matmul %18, %10, %cst_18 {dimension_numbers = #tpu.dot_dimension_numbers<[1], [0], [0], [1], [0, 0, 1, 1], [], []>} : vector<8x128xf32>, vector<128x128xf32>, vector<8x128xf32> -> vector<8x128xf32>
    %26 = arith.addf %24, %25 : vector<8x128xf32>
    %27 = math.tanh %26 : vector<8x128xf32>
    %28 = arith.index_cast %22 : i32 to index
    %c0_19 = arith.constant 0 : index
    %29 = vector.load %arg9[%28, %c0_19] : memref<16x128xf32, #tpu.memory_space<vmem>>, vector<8x128xf32>
    tpu.vector_store %arg9[%28, %c0_19], %27 {strides = array<i32>} : memref<16x128xf32, #tpu.memory_space<vmem>>, vector<8x128xf32>,
    %c2_i32 = arith.constant 2 : i32
    %c0_20 = arith.constant 0 : index
    %c0_21 = arith.constant 0 : index
    %30 = vector.load %arg10[%c0_20, %c0_21] : memref<8x128xf32, #tpu.memory_space<vmem>>, vector<8x128xf32>
    tpu.vector_store %arg10[%c0_20, %c0_21], %27 {strides = array<i32>} : memref<8x128xf32, #tpu.memory_space<vmem>>, vector<8x128xf32>,
    %c0_22 = arith.constant 0 : index
    %c0_23 = arith.constant 0 : index
    %31 = vector.load %arg9[%c0_22, %c0_23] : memref<16x128xf32, #tpu.memory_space<vmem>>, vector<16x128xf32>
    %c0_24 = arith.constant 0 : index
    %c0_25 = arith.constant 0 : index
    %32 = vector.load %arg5[%c0_24, %c0_25] : memref<128x128xf32, #tpu.memory_space<vmem>>, vector<128x128xf32>
    %cst_26 = arith.constant dense<0.000000e+00> : vector<16x128xf32>
    %33 = tpu.matmul %31, %32, %cst_26 {dimension_numbers = #tpu.dot_dimension_numbers<[1], [0], [0], [1], [0, 0, 1, 1], [], []>} : vector<16x128xf32>, vector<128x128xf32>, vector<16x128xf32> -> vector<16x128xf32>
    %c0_27 = arith.constant 0 : index
    %c0_28 = arith.constant 0 : index
    %34 = vector.load %arg7[%c0_27, %c0_28] : memref<1x128xf32, #tpu.memory_space<vmem>>, vector<1x128xf32>
    %35 = vector.broadcast %34 : vector<1x128xf32> to vector<16x128xf32>
    %36 = arith.addf %33, %35 : vector<16x128xf32>
    %c0_29 = arith.constant 0 : index
    %c0_30 = arith.constant 0 : index
    %37 = vector.load %arg8[%c0_29, %c0_30] : memref<16x128xf32, #tpu.memory_space<vmem>>, vector<16x128xf32>
    tpu.vector_store %arg8[%c0_29, %c0_30], %36 {strides = array<i32>} : memref<16x128xf32, #tpu.memory_space<vmem>>, vector<16x128xf32>,
    return
  }
  func.func @transform_0(%arg0: i32) -> (i32, i32) {
    %c0_i32 = arith.constant 0 : i32
    %c0_i32_0 = arith.constant 0 : i32
    return %arg0, %c0_i32 : i32, i32
  }
  func.func @transform_1(%arg0: i32) -> (i32, i32) {
    %c0_i32 = arith.constant 0 : i32
    %c0_i32_0 = arith.constant 0 : i32
    %c0_i32_1 = arith.constant 0 : i32
    return %c0_i32, %c0_i32_0 : i32, i32
  }
  func.func @transform_2(%arg0: i32) -> (i32, i32) {
    %c0_i32 = arith.constant 0 : i32
    %c0_i32_0 = arith.constant 0 : i32
    %c0_i32_1 = arith.constant 0 : i32
    return %c0_i32, %c0_i32_0 : i32, i32
  }
  func.func @transform_3(%arg0: i32) -> (i32, i32) {
    %c0_i32 = arith.constant 0 : i32
    %c0_i32_0 = arith.constant 0 : i32
    %c0_i32_1 = arith.constant 0 : i32
    return %c0_i32, %c0_i32_0 : i32, i32
  }
  func.func @transform_4(%arg0: i32) -> (i32, i32) {
    %c0_i32 = arith.constant 0 : i32
    %c0_i32_0 = arith.constant 0 : i32
    %c0_i32_1 = arith.constant 0 : i32
    return %c0_i32, %c0_i32_0 : i32, i32
  }
  func.func @transform_5(%arg0: i32) -> (i32, i32) {
    %c0_i32 = arith.constant 0 : i32
    %c0_i32_0 = arith.constant 0 : i32
    %c0_i32_1 = arith.constant 0 : i32
    return %c0_i32, %c0_i32_0 : i32, i32
  }
  func.func @transform_6(%arg0: i32) -> (i32, i32) {
    %c0_i32 = arith.constant 0 : i32
    %c0_i32_0 = arith.constant 0 : i32
    %c0_i32_1 = arith.constant 0 : i32
    return %c0_i32, %c0_i32_0 : i32, i32
  }
  func.func @transform_7(%arg0: i32) -> (i32, i32) {
    %c0_i32 = arith.constant 0 : i32
    %c0_i32_0 = arith.constant 0 : i32
    return %arg0, %c0_i32 : i32, i32
  }
  func.func @transform_8(%arg0: i32) -> (i32, i32) {
    %c0_i32 = arith.constant 0 : i32
    %c0_i32_0 = arith.constant 0 : i32
    return %arg0, %c0_i32 : i32, i32
  }
}

</mosaic_0001>

<bundles_post_ra>
// kernel: tpu_custom_call.1
= control target key start
LH: loop header
LB: loop body
LE: loop exit
PB: predicated region body
PF: predicated region fallthrough
CT: control target
= control target key end

     0   :  { %s1893_s0 = inlined_call_operand.hbm [shape: f32[64,128], index: 0, kind: input, shape index: {}]   ;;  %s1894_s1 = inlined_call_operand.vmem [shape: f32[1,128], index: 1, kind: input, shape index: {}]   ;;  %s1895_s2 = inlined_call_operand.hbm [shape: f32[128,128], index: 2, kind: input, shape index: {}]   ;;  %s1896_s3 = inlined_call_operand.hbm [shape: f32[128,128], index: 3, kind: input, shape index: {}]   ;;  %s1897_s4 = inlined_call_operand.hbm [shape: f32[128,128], index: 4, kind: input, shape index: {}]   ;;  %s1898_s5 = inlined_call_operand.vmem [shape: f32[1,128], index: 5, kind: input, shape index: {}]   ;;  %s1899_s6 = inlined_call_operand.vmem [shape: f32[1,128], index: 6, kind: input, shape index: {}]   ;;  %s1900_s7 = inlined_call_operand.hbm [shape: f32[64,128], index: 7, kind: output, shape index: {0}]   ;;  %s1901_s8 = inlined_call_operand.hbm [shape: f32[64,128], index: 8, kind: output, shape index: {1}]  }
   0x1   :  { %1908 = sst [smem:[#allocation20_spill]] %s1895_s2 }
   0x2   :  { %1909 = sst [smem:[#allocation21_spill]] %s1896_s3 }
   0x3   :  { %14 = vsyncpa [#allocation5], 0 }
   0x4   :  { %16 = vsyncpa [#allocation5 + $0x1], 0 }
   0x5   :  { %17 = vsyncpa [#allocation8], 0 }
   0x6   :  { %18 = vsyncpa [#allocation11], 0 }
   0x7   :  { %19 = vsyncpa [#allocation6], 0 }
   0x8   :  { %21 = vsyncpa [#allocation6 + $0x1], 0 }
   0x9   :  { %22 = vsyncpa [#allocation14], 0 }
   0xa   :  { %24 = vsyncpa [#allocation14 + $0x1], 0  ;;  %s1536_s27 = smov 0   ;;  %s1538_s28 = smov 0  }
   0xb   :  { %s1540_s29 = smov 0   ;;  %s1542_s30 = smov 0  }
   0xc LB: > { %s1557_s9 = sadd.s32 4294967295, %s1477_s30   ;;  %s935_s10 = sadd.s32 4294967294, %s1477_s30   ;;  %s1477_s30 = sphi %s1542_s30, %s1932_s30   ;;  %s1473_s29 = sphi %s1540_s29, %s1931_s29   ;;  %s1469_s28 = sphi %s1538_s28, %s1930_s28   ;;  %s1465_s27 = sphi %s1536_s27, %s1929_s27  }
   0xd   : > { %p50_p0 = scmp.ne.s32.totalorder %s1469_s28, %s1465_s27  ;;  %p1902_p1 = scmp.eq.s32.totalorder %s1557_s9, 0 }
   0xe   : > { %p200_p2 = scmp.eq.s32.totalorder %s1557_s9, 3  ;;  %p206_p3 = scmp.eq.s32.totalorder %s935_s10, 3 }
   0xf   : > { %p1566_p4 = por %p1902_p1, %p50_p0  ;;  %p936_p5 = scmp.ge.s32.totalorder %s1477_s30, 1 }
  0x10   : > { %p1571_p6 = por %p206_p3, %p50_p0  ;;  %p239_p7 = scmp.lt.s32.totalorder %s1477_s30, 5 }
  0x11   : > { %s1910_s11 = scalar_select %p1566_p4, 1, 0 }
  0x12   : > { %s1911_s12 = scalar_select %p1571_p6, 1, 0 }
  0x13   : > { %p1577_p9 = pnand %p936_p5, %p239_p7  ;;  %s1479_s14 = smov [#allocation7]  }
  0x14   : > { %s254_s15 = sshll.u32 %s1479_s14, 4  ;;  %s1480_s17 = smov [#allocation9]   ;;  %s255_s15 = int_to_ptr.vmem [resolvable:$true] %s254_s15 }
  0x15   : > { %s1912_s13 = scalar_select %p1577_p9, 1, 0 }
  0x16   : > { %p1195_p10 = pneg %p1577_p9  ;;  %s267_s18 = sshll.u32 %s1480_s17, 4  ;;  %s268_s18 = int_to_ptr.vmem [resolvable:$true] %s267_s18 }
  0x17   : > { %s1481_s19 = smov [#allocation10]   ;;  %s1280_s21 = scalar_lea.vmem %s255_s15, 2048 }
  0x18   : > { %p1585_p11 = pnand %p1195_p10, %p1902_p1  ;;  %s280_s20 = sshll.u32 %s1481_s19, 4  ;;  %s281_s20 = int_to_ptr.vmem [resolvable:$true] %s280_s20 }
  0x19   : > { %p1281_p13 = scmp.ne.s32.totalorder %s255_s15, %s1280_s21  ;;  %p1288_p5 = scmp.lt.s32.totalorder %s255_s15, %s255_s15 }
  0x1a   : > { %p1271_p12 = pneg %p1585_p11  ;;  %p1289_p7 = scmp.lt.s32.totalorder %s1280_s21, %s1280_s21 }
  0x1c   : > { %p1283_p0 = pnand %p1281_p13, %p1271_p12  ;;  %p1290_p10 = por %p1289_p7, %p1288_p5 }
  0x1e   : > { %p1284_p3 = pneg %p1283_p0 }
  0x20   : > { %p1291_p8 = pnand %p1290_p10, %p1284_p3 }
  0x22   : > { %1294 = shalt.err (!%p1291_p8)
}
  0x23   : > { %s1903_s22 = smov 128   ;;  %s1904_s23 = smov 8  }
  0x24   : > { %s1914_s2 = sld [smem:[#allocation20_spill]]  ;;  %s1306_s26 = scalar_lea.vmem %s268_s18, 2048 }
  0x25   : > { %p1307_p13 = scmp.ne.s32.totalorder %s268_s18, %s1306_s26  ;;  %p1314_p3 = scmp.lt.s32.totalorder %s268_s18, %s268_s18 }
  0x26   : > { %p1315_p8 = scmp.lt.s32.totalorder %s1306_s26, %s1306_s26 }
  0x27   : > { %p1309_p0 = pnand %p1307_p13, %p1271_p12 }
  0x28   : > { %p1316_p7 = por %p1315_p8, %p1314_p3 }
  0x29   : > { %p1310_p5 = pneg %p1309_p0 }
  0x2a   : > { %1198 = dma.hbm_to_vmem [thread:$0]  (!%p1585_p11), %s1914_s2, 2048, %s255_s15, [#allocation8], %s1903_s22, %s1903_s22, %s1904_s23  }
  0x2b   : > { %p1317_p10 = pnand %p1316_p7, %p1310_p5 }
  0x2d   : > { %1320 = shalt.err (!%p1317_p10)
}
  0x2e   : > { %s1915_s3 = sld [smem:[#allocation21_spill]]  ;;  %s1332_s15 = scalar_lea.vmem %s281_s20, 2048 }
  0x2f   : > { %p1333_p1 = scmp.ne.s32.totalorder %s281_s20, %s1332_s15  ;;  %p1340_p3 = scmp.lt.s32.totalorder %s281_s20, %s281_s20 }
  0x30   : > { %p1341_p5 = scmp.lt.s32.totalorder %s1332_s15, %s1332_s15 }
  0x31   : > { %p1335_p13 = pnand %p1333_p1, %p1271_p12 }
  0x32   : > { %p1342_p8 = por %p1341_p5, %p1340_p3 }
  0x33   : > { %p1336_p0 = pneg %p1335_p13 }
  0x34   : > { %1201 = dma.hbm_to_vmem [thread:$0]  (!%p1585_p11), %s1915_s3, 2048, %s268_s18, [#allocation8], %s1903_s22, %s1903_s22, %s1904_s23  }
  0x35   : > { %p1343_p7 = pnand %p1342_p8, %p1336_p0 }
  0x37   : > { %1346 = shalt.err (!%p1343_p7)
}
  0x38   : > { %1204 = dma.hbm_to_vmem [thread:$0]  (!%p1585_p11), %s1897_s4, 2048, %s281_s20, [#allocation11], %s1903_s22, %s1903_s22, %s1904_s23  }
  0x39   : > { %s1625_s18 = sadd.s32 1, %s1477_s30   ;;  %s37_s21 = sadd.s32 1, %s1473_s29 }
  0x3a   : > { %s34_s16 = ssub.s32 %s1477_s30, %s1625_s18  ;;  %p44_p12 = scmp.ne.s32.totalorder %s1473_s29, %s1469_s28 }
  0x3b   : > { %p35_p1 = scmp.eq.s32.totalorder %s34_s16, 0  ;;  %p45_p10 = scmp.eq.s32.totalorder %s1477_s30, 0 }
  0x3c   : > { %p1219_p13 = scmp.lt.s32.totalorder %s1477_s30, 4  ;;  %p1639_p3 = por %p200_p2, %p44_p12 }
  0x3d   : > { %s1635_s24 = scalar_select %p35_p1, %s1473_s29, %s37_s21  }
  0x3e   : > { %p46_p0 = por %p45_p10, %p44_p12  ;;  %s300_s26 = sand.u32 1, %s1473_s29  }
  0x3f   : > { %s1916_s25 = scalar_select %p1639_p3, 1, 0 }
  0x40   : > { %s964_s10 = sshll.u32 %s1477_s30, 8  ;;  %s941_s20 = sshll.u32 %s300_s26, 4 }
  0x41   : > { %s1648_s17 = scalar_lea.hbm %s1893_s0, %s964_s10  ;;  %s304_s19 = scalar_lea.vmem [#allocation4], %s941_s20 }
  0x42   : > { %s311_s16 = sshll.u32 %s304_s19, 4  ;;  %p1650_p11 = pnand %p1219_p13, %p46_p0  ;;  %s1654_s16 = int_to_ptr.vmem [resolvable:$true] %s311_s16 }
  0x43   : > { %s1656_s22 = scalar_lea.sflag [#allocation5], %s300_s26  ;;  %s1347_s23 = scalar_lea.hbm %s1648_s17, 256 }
  0x44   : > { %p1348_p2 = scmp.ne.s32.totalorder %s1648_s17, %s1347_s23  ;;  %p1349_p5 = pneg %p1650_p11 }
  0x45   : > { %s1352_s20 = scalar_lea.hbm %s1893_s0, 1024  ;;  %p1353_p1 = scmp.lt.s32.totalorder %s1648_s17, %s1893_s0 }
  0x46   : > { %p1350_p8 = pnand %p1349_p5, %p1348_p2  ;;  %p1354_p12 = scmp.lt.s32.totalorder %s1352_s20, %s1347_s23 }
  0x48   : > { %p1351_p7 = pneg %p1350_p8  ;;  %p1355_p10 = por %p1354_p12, %p1353_p1 }
  0x4a   : > { %p1356_p13 = pnand %p1355_p10, %p1351_p7 }
  0x4c   : > { %1359 = shalt.err (!%p1356_p13)
}
  0x4d   : > { %s1360_s26 = scalar_lea.vmem %s1654_s16, 256  ;;  %s1484_s2 = smov [#allocation4]  }
  0x4e   : > { %p1361_p0 = scmp.ne.s32.totalorder %s1654_s16, %s1360_s26  ;;  %s1365_s3 = sshll.u32 %s1484_s2, 4  ;;  %s1366_s3 = int_to_ptr.vmem [resolvable:$false] %s1365_s3 }
  0x4f   : > { %s1367_s10 = scalar_lea.vmem %s1366_s3, 512  ;;  %p1368_p8 = scmp.lt.s32.totalorder %s1654_s16, %s1366_s3 }
  0x50   : > { %p1363_p6 = pnand %p1361_p0, %p1349_p5  ;;  %p1369_p3 = scmp.lt.s32.totalorder %s1367_s10, %s1360_s26 }
  0x52   : > { %p1364_p2 = pneg %p1363_p6  ;;  %p1370_p4 = por %p1369_p3, %p1368_p8 }
  0x54   : > { %p1371_p9 = pnand %p1370_p4, %p1364_p2 }
  0x56   : > { %1374 = shalt.err (!%p1371_p9)
}
  0x57   : > { %s1918_s23 = smov 8   ;;  %s1919_s14 = smov 128  }
  0x58   : > { %1208 = dma.hbm_to_vmem [thread:$0]  (!%p1650_p11), %s1648_s17, 256, %s1654_s16, %s1656_s22, %s1919_s14, %s1919_s14, %s1918_s23  }
  0x59   : > { %p1920_p6 = scmp.ne.s32.totalorder %s1912_s13, 0 }
  0x5a   : > { %s1683_s2 = sand.u32 (!%p1920_p6), 1, %s1469_s28   ;;  %p1921_p4 = scmp.ne.s32.totalorder (!%p1920_p6), %s1910_s11, 0 }
  0x5b   : > { %323 = sbr.rel (%p1920_p6) target bundleno = 779 (0x30b), region = 48  ;;  %s1686_s3 = sshll.u32 (!%p1920_p6), %s1683_s2, 4 }
  0x5c   : > { %s326_s21 = scalar_lea.sflag (!%p1920_p6), [#allocation5], %s1683_s2  ;;  %s329_s20 = scalar_lea.vmem (!%p1920_p6), [#allocation4], %s1686_s3 }
  0x60   : > { %1444 = dma.done.wait (%p1921_p4), %s326_s21, 256  }
  0x61   : > { %1446 = vsyncadd (%p1921_p4), %s326_s21, 4294967040  ;;  %p1922_p9 = scmp.eq.s32.totalorder %s1557_s9, 0 }
  0x63   : > { %1448 = dma.done.wait (%p1922_p9), [#allocation8], 4096   ;;  %p1923_p3 = pmov %p1922_p9 }
  0x65   : > { %1450 = vsyncadd (%p1923_p3), [#allocation8], 4294963200  ;;  %p1924_p11 = pmov %p1923_p3 }
  0x66   : > { %p1925_p5 = pmov %p1923_p3 }
  0x67   : > { %1452 = dma.done.wait (%p1924_p11), [#allocation11], 2048  }
  0x68   : > { %1454 = vsyncadd (%p1925_p5), [#allocation11], 4294965248  ;;  %s1703_s13 = scalar_lea.vmem [#allocation12], %s1686_s3  ;;  %s1706_s22 = scalar_lea.vmem [#allocation13], %s1686_s3 }
  0x69   : > { %p1926_p7 = scmp.ne.s32.totalorder %s1557_s9, 0 }
  0x6b   : > { %385 = sbr.rel (%p1926_p7) target bundleno = 114 (0x72), region = 68 }
  0x70   : > { %v952_v0 = vld [vmem:[%s1894_s1] ss:$0 sm:$0xff] }
  0x71   : > { %393 = vst [vmem:[#allocation2] sm:$0xff] %v952_v0 }
  0x72 PF: > { %v411_v1 = vld [vmem:[#allocation7 + $0x78] sm:$0xff]  ;;  %v410_v2 = vld [vmem:[#allocation7 + $0x70] sm:$0xff]  ;;  %v1485_v4 = vmov 0.0   ;;  %v409_v6 = vld [vmem:[#allocation7 + $0x68] sm:$0xff]  ;;  %vm1486_vm0 = vmmov 0   ;;  %s965_s19 = sshll.u32 %s1557_s9, 8 }
  0x73   : > { %v1713_v3 = vld [vmem:[#allocation9 + $0x78] sm:$0xff]  ;;  %1037 = vmatprep.subr.mxu0 %v411_v1  ;;  %1072 = vmatprep.subr.mxu1 %v1485_v4  ;;  %v1716_v5 = vld [vmem:[#allocation9 + $0x70] sm:$0xff]  ;;  %v1720_v7 = vld [vmem:[#allocation9 + $0x68] sm:$0xff]  ;;  %s1806_s23 = scalar_lea.hbm %s1901_s8, %s965_s19  ;;  %s801_s14 = sshll.u32 %s1706_s22, 4  ;;  %s1809_s14 = int_to_ptr.vmem [resolvable:$true] %s801_s14 }
  0x74   : > { %1038 = vmatpush3.msra.mxu0 %v411_v1  ;;  %1073 = vmatpush3.msra.mxu1 %v1713_v3  ;;  %v408_v8 = vld [vmem:[#allocation7 + $0x60] sm:$0xff]  ;;  %v407_v10 = vld [vmem:[#allocation7 + $0x58] sm:$0xff]  ;;  %v406_v12 = vld [vmem:[#allocation7 + $0x50] sm:$0xff]  ;;  %s772_s3 = scalar_lea.sflag [#allocation14], %s1683_s2  ;;  %s1375_s21 = scalar_lea.vmem %s1809_s14, 256 }
  0x75   : > { %1039 = vmatprep.subr.mxu0 %v410_v2  ;;  %1074 = vmatprep.subr.mxu1 %v1485_v4  ;;  %v1724_v9 = vld [vmem:[#allocation9 + $0x60] sm:$0xff]  ;;  %v1728_v11 = vld [vmem:[#allocation9 + $0x58] sm:$0xff]  ;;  %v1732_v13 = vld [vmem:[#allocation9 + $0x50] sm:$0xff]  ;;  %p1376_p1 = scmp.ne.s32.totalorder %s1809_s14, %s1375_s21  ;;  %p1927_p12 = scmp.ne.s32.totalorder %s1916_s25, 0 }
  0x76   : > { %1040 = vmatpush3.msra.mxu0 %v410_v2  ;;  %1075 = vmatpush3.msra.mxu1 %v1716_v5  ;;  %v405_v14 = vld [vmem:[#allocation7 + $0x48] sm:$0xff]  ;;  %v404_v16 = vld [vmem:[#allocation7 + $0x40] sm:$0xff]  ;;  %v403_v18 = vld [vmem:[#allocation7 + $0x38] sm:$0xff] }
  0x77   : > { %1041 = vmatprep.subr.mxu0 %v409_v6  ;;  %1076 = vmatprep.subr.mxu1 %v1485_v4  ;;  %v1736_v15 = vld [vmem:[#allocation9 + $0x48] sm:$0xff]  ;;  %v1740_v17 = vld [vmem:[#allocation9 + $0x40] sm:$0xff]  ;;  %v1744_v19 = vld [vmem:[#allocation9 + $0x38] sm:$0xff]  ;;  %p1377_p10 = pnand %p1376_p1, %p1927_p12 }
  0x78   : > { %1042 = vmatpush3.msra.mxu0 %v409_v6  ;;  %1077 = vmatpush3.msra.mxu1 %v1720_v7  ;;  %v402_v20 = vld [vmem:[#allocation7 + $0x30] sm:$0xff]  ;;  %v401_v22 = vld [vmem:[#allocation7 + $0x28] sm:$0xff]  ;;  %v400_v24 = vld [vmem:[#allocation7 + $0x20] sm:$0xff] }
  0x79   : > { %1043 = vmatprep.subr.mxu0 %v408_v8  ;;  %1078 = vmatprep.subr.mxu1 %v1485_v4  ;;  %v1748_v21 = vld [vmem:[#allocation9 + $0x30] sm:$0xff]  ;;  %v1752_v23 = vld [vmem:[#allocation9 + $0x28] sm:$0xff]  ;;  %v500_v25 = vld [vmem:[#allocation9 + $0x20] sm:$0xff]  ;;  %p1378_p13 = pneg %p1377_p10 }
  0x7a   : > { %1044 = vmatpush3.msra.mxu0 %v408_v8  ;;  %1079 = vmatpush3.msra.mxu1 %v1724_v9  ;;  %v399_v26 = vld [vmem:[#allocation7 + $0x18] sm:$0xff]  ;;  %v398_v28 = vld [vmem:[#allocation7 + $0x10] sm:$0xff]  ;;  %v397_v30 = vld [vmem:[#allocation7 + $0x8] sm:$0xff] }
  0x7b   : > { %1045 = vmatprep.subr.mxu0 %v407_v10  ;;  %1080 = vmatprep.subr.mxu1 %v1485_v4  ;;  %v499_v27 = vld [vmem:[#allocation9 + $0x18] sm:$0xff]  ;;  %v498_v29 = vld [vmem:[#allocation9 + $0x10] sm:$0xff]  ;;  %v396_v32 = vld [vmem:[#allocation7] sm:$0xff] }
  0x7c   : > { %1046 = vmatpush3.msra.mxu0 %v407_v10  ;;  %1081 = vmatpush3.msra.mxu1 %v1728_v11  ;;  %v394_v31 = vld [vmem:[%s329_s20] sm:$0xff]  ;;  %v497_v33 = vld [vmem:[#allocation9 + $0x8] sm:$0xff]  ;;  %v512_v36 = vld [vmem:[#allocation2] sm:$0xff] }
  0x7d   : > { %1047 = vmatprep.subr.mxu0 %v406_v12  ;;  %1082 = vmatprep.subr.mxu1 %v1485_v4  ;;  %v395_v34 = vld [vmem:[%s329_s20 + $0x8] sm:$0xff]  ;;  %v496_v35 = vld [vmem:[#allocation9] sm:$0xff]  ;;  %v680_v38 = vld [vmem:[#allocation10 + $0x70] sm:$0xff]  ;;  %s1487_s20 = smov [#allocation13]  }
  0x7e   : > { %1048 = vmatpush3.msra.mxu0 %v406_v12  ;;  %1083 = vmatpush3.msra.mxu1 %v1732_v13  ;;  %v681_v37 = vld [vmem:[#allocation10 + $0x78] sm:$0xff]  ;;  %v679_v39 = vld [vmem:[#allocation10 + $0x68] sm:$0xff]  ;;  %v678_v40 = vld [vmem:[#allocation10 + $0x60] sm:$0xff]  ;;  %s1379_s11 = sshll.u32 %s1487_s20, 4  ;;  %s1380_s11 = int_to_ptr.vmem [resolvable:$false] %s1379_s11 }
  0x7f   : > { %1049 = vmatprep.subr.mxu0 %v405_v14  ;;  %1084 = vmatprep.subr.mxu1 %v1485_v4  ;;  %v953_v41 = vld [vmem:[%s1898_s5] ss:$0 sm:$0xff]  ;;  %v676_v51 = vld [vmem:[#allocation10 + $0x50] sm:$0xff]  ;;  %v675_v52 = vld [vmem:[#allocation10 + $0x48] sm:$0xff]  ;;  %s1381_s17 = scalar_lea.vmem %s1380_s11, 512  ;;  %p1382_p0 = scmp.lt.s32.totalorder %s1809_s14, %s1380_s11 }
  0x80   : > { %1050 = vmatpush3.msra.mxu0 %v405_v14  ;;  %1085 = vmatpush3.msra.mxu1 %v1736_v15  ;;  %v677_v50 = vld [vmem:[#allocation10 + $0x58] sm:$0xff]  ;;  %v674_v53 = vld [vmem:[#allocation10 + $0x40] sm:$0xff]  ;;  %v672_v55 = vld [vmem:[#allocation10 + $0x30] sm:$0xff]  ;;  %p1383_p2 = scmp.lt.s32.totalorder %s1381_s17, %s1375_s21 }
  0x81   : > { %1051 = vmatprep.subr.mxu0 %v404_v16  ;;  %1086 = vmatprep.subr.mxu1 %v1485_v4  ;;  %v673_v54 = vld [vmem:[#allocation10 + $0x38] sm:$0xff]  ;;  %v671_v56 = vld [vmem:[#allocation10 + $0x28] sm:$0xff]  ;;  %v670_v57 = vld [vmem:[#allocation10 + $0x20] sm:$0xff] }
  0x82   : > { %1052 = vmatpush3.msra.mxu0 %v404_v16  ;;  %1087 = vmatpush3.msra.mxu1 %v1740_v17  ;;  %v669_v58 = vld [vmem:[#allocation10 + $0x18] sm:$0xff]  ;;  %v668_v59 = vld [vmem:[#allocation10 + $0x10] sm:$0xff]  ;;  %v667_v60 = vld [vmem:[#allocation10 + $0x8] sm:$0xff]  ;;  %p1384_p8 = por %p1383_p2, %p1382_p0 }
  0x83   : > { %1053 = vmatprep.subr.mxu0 %v403_v18  ;;  %1088 = vmatprep.subr.mxu1 %v1485_v4  ;;  %v666_v61 = vld [vmem:[#allocation10] sm:$0xff] }
  0x84   : > { %1054 = vmatpush3.msra.mxu0 %v403_v18  ;;  %1089 = vmatpush3.msra.mxu1 %v1744_v19  ;;  %p1385_p6 = pnand %p1384_p8, %p1378_p13 }
  0x85   : > { %1055 = vmatprep.subr.mxu0 %v402_v20  ;;  %1090 = vmatprep.subr.mxu1 %v1485_v4 }
  0x86   : > { %1056 = vmatpush3.msra.mxu0 %v402_v20  ;;  %1091 = vmatpush3.msra.mxu1 %v1748_v21 }
  0x87   : > { %1057 = vmatprep.subr.mxu0 %v401_v22  ;;  %1092 = vmatprep.subr.mxu1 %v1485_v4 }
  0x88   : > { %1058 = vmatpush3.msra.mxu0 %v401_v22  ;;  %1093 = vmatpush3.msra.mxu1 %v1752_v23 }
  0x89   : > { %1059 = vmatprep.subr.mxu0 %v400_v24  ;;  %1094 = vmatprep.subr.mxu1 %v1485_v4 }
  0x8a   : > { %1060 = vmatpush3.msra.mxu0 %v400_v24  ;;  %1095 = vmatpush3.msra.mxu1 %v500_v25 }
  0x8b   : > { %1061 = vmatprep.subr.mxu0 %v399_v26  ;;  %1096 = vmatprep.subr.mxu1 %v1485_v4 }
  0x8c   : > { %1062 = vmatpush3.msra.mxu0 %v399_v26  ;;  %1097 = vmatpush3.msra.mxu1 %v499_v27 }
  0x8d   : > { %1063 = vmatprep.subr.mxu0 %v398_v28  ;;  %1098 = vmatprep.subr.mxu1 %v1485_v4 }
  0x8e   : > { %1064 = vmatpush3.msra.mxu0 %v398_v28  ;;  %1099 = vmatpush3.msra.mxu1 %v498_v29 }
  0x8f   : > { %1065 = vmatprep.subr.mxu0 %v397_v30  ;;  %1100 = vmatprep.subr.mxu1 %v1485_v4 }
  0x90   : > { %1066 = vmatpush3.msra.mxu0 %v397_v30  ;;  %1069 = vmatprep.mubr.f32.mxu0 %v394_v31 }
  0x91   : > { %1067 = vmatprep.subr.mxu0 %v396_v32  ;;  %1101 = vmatpush3.msra.mxu1 %v497_v33 }
  0x92   : > { %1068 = vmatpush3.msra.mxu0 %v396_v32  ;;  %1102 = vmatprep.subr.mxu1 %v1485_v4 }
  0x93   : > { %1070 = vmatmul.mubr.f32.vlgmr.msra.gmra.mxu0 %v395_v34  ;;  %1103 = vmatpush3.msra.mxu1 %v496_v35 }
  0x94   : > { %1104 = vmatprep.mubr.msk.f32.mxu1 %vm1486_vm0, %v1485_v4  ;;  %1107 = vmatprep.subr.mxu0 %v1485_v4 }
  0x95   : > { %1105 = vmatmul.mubr.f32.vlgmr.msra.gmra.mxu1 %v512_v36  ;;  %1108 = vmatpush3.msra.mxu0 %v1713_v3 }
  0x96   : > { %1109 = vmatprep.subr.mxu0 %v1485_v4  ;;  %1139 = vmatprep.mubr.msk.f32.mxu0 %vm1486_vm0, %v1485_v4 }
  0x97   : > { %1110 = vmatpush3.msra.mxu0 %v1716_v5  ;;  %1142 = vmatprep.subr.mxu1 %v681_v37 }
  0x98   : > { %1111 = vmatprep.subr.mxu0 %v1485_v4  ;;  %1143 = vmatpush3.msra.mxu1 %v681_v37 }
  0x99   : > { %1112 = vmatpush3.msra.mxu0 %v1720_v7  ;;  %1144 = vmatprep.subr.mxu1 %v680_v38 }
  0x9a   : > { %1113 = vmatprep.subr.mxu0 %v1485_v4  ;;  %1145 = vmatpush3.msra.mxu1 %v680_v38 }
  0x9b   : > { %1114 = vmatpush3.msra.mxu0 %v1724_v9  ;;  %1146 = vmatprep.subr.mxu1 %v679_v39 }
  0x9c   : > { %1115 = vmatprep.subr.mxu0 %v1485_v4  ;;  %1147 = vmatpush3.msra.mxu1 %v679_v39 }
  0x9d   : > { %1116 = vmatpush3.msra.mxu0 %v1728_v11  ;;  %1148 = vmatprep.subr.mxu1 %v678_v40 }
  0x9e   : > { %1117 = vmatprep.subr.mxu0 %v1485_v4  ;;  %1149 = vmatpush3.msra.mxu1 %v678_v40 }
  0x9f   : > { %1118 = vmatpush3.msra.mxu0 %v1732_v13  ;;  %1150 = vmatprep.subr.mxu1 %v677_v50 }
  0xa0   : > { %1119 = vmatprep.subr.mxu0 %v1485_v4  ;;  %1151 = vmatpush3.msra.mxu1 %v677_v50 }
  0xa1   : > { %1120 = vmatpush3.msra.mxu0 %v1736_v15  ;;  %1152 = vmatprep.subr.mxu1 %v676_v51 }
  0xa2   : > { %1121 = vmatprep.subr.mxu0 %v1485_v4  ;;  %1153 = vmatpush3.msra.mxu1 %v676_v51 }
  0xa3   : > { %1122 = vmatpush3.msra.mxu0 %v1740_v17  ;;  %1154 = vmatprep.subr.mxu1 %v675_v52 }
  0xa4   : > { %1123 = vmatprep.subr.mxu0 %v1485_v4  ;;  %1155 = vmatpush3.msra.mxu1 %v675_v52 }
  0xa5   : > { %1124 = vmatpush3.msra.mxu0 %v1744_v19  ;;  %1156 = vmatprep.subr.mxu1 %v674_v53 }
  0xa6   : > { %1125 = vmatprep.subr.mxu0 %v1485_v4  ;;  %1157 = vmatpush3.msra.mxu1 %v674_v53 }
  0xa7   : > { %1126 = vmatpush3.msra.mxu0 %v1748_v21  ;;  %1158 = vmatprep.subr.mxu1 %v673_v54 }
  0xa8   : > { %1127 = vmatprep.subr.mxu0 %v1485_v4  ;;  %1159 = vmatpush3.msra.mxu1 %v673_v54 }
  0xa9   : > { %1128 = vmatpush3.msra.mxu0 %v1752_v23  ;;  %1160 = vmatprep.subr.mxu1 %v672_v55 }
  0xaa   : > { %1129 = vmatprep.subr.mxu0 %v1485_v4  ;;  %1161 = vmatpush3.msra.mxu1 %v672_v55 }
  0xab   : > { %1130 = vmatpush3.msra.mxu0 %v500_v25  ;;  %1162 = vmatprep.subr.mxu1 %v671_v56 }
  0xac   : > { %1131 = vmatprep.subr.mxu0 %v1485_v4  ;;  %1163 = vmatpush3.msra.mxu1 %v671_v56 }
  0xad   : > { %1132 = vmatpush3.msra.mxu0 %v499_v27  ;;  %1164 = vmatprep.subr.mxu1 %v670_v57 }
  0xae   : > { %1133 = vmatprep.subr.mxu0 %v1485_v4  ;;  %1165 = vmatpush3.msra.mxu1 %v670_v57 }
  0xaf   : > { %1134 = vmatpush3.msra.mxu0 %v498_v29  ;;  %1166 = vmatprep.subr.mxu1 %v669_v58 }
  0xb0   : > { %1135 = vmatprep.subr.mxu0 %v1485_v4  ;;  %1167 = vmatpush3.msra.mxu1 %v669_v58 }
  0xb1   : > { %1136 = vmatpush3.msra.mxu0 %v497_v33  ;;  %1168 = vmatprep.subr.mxu1 %v668_v59 }
  0xb2   : > { %1137 = vmatprep.subr.mxu0 %v1485_v4  ;;  %1169 = vmatpush3.msra.mxu1 %v668_v59 }
  0xb3   : > { %1138 = vmatpush3.msra.mxu0 %v496_v35  ;;  %1170 = vmatprep.subr.mxu1 %v667_v60 }
  0xb4   : > { %1171 = vmatpush3.msra.mxu1 %v667_v60 }
  0xb5   : > { %1172 = vmatprep.subr.mxu1 %v666_v61 }
  0xb6   : > { %1173 = vmatpush3.msra.mxu1 %v666_v61 }
 0x153   : > { %v1071_v42 = vpop.f32.mrf.mxu0 }
 0x154   : > { %v491_v43 = vadd.f32 %v1071_v42, %v953_v41 }
 0x155   : > { %v485_v44 = vpop.f32.mrf.mxu0  ;;  %v580_v45 = vpop.f32.mrf.mxu1 }
 0x156   : > { %v486_v46 = vadd.f32 %v953_v41, %v485_v44 }
 0x157   : > { %v1106_v47 = vpop.f32.mrf.mxu1 }
 0x158   : > { %v584_v48 = vadd.f32 %v580_v45, %v486_v46 }
 0x15a   : > { %1265 = vtanh.f32 %v584_v48 }
 0x167   : > { %v1266_v49 = vpop.eup %1265 }
 0x168   : > { %586 = vst [vmem:[%s1706_s22] sm:$0xff] %v1266_v49  ;;  %1140 = vmatmul.mubr.f32.vlgmr.msra.gmra.mxu0 %v1266_v49  ;;  %1174 = vmatprep.mubr.f32.mxu1 %v1266_v49 }
 0x228   : > { %v655_v62 = vpop.f32.mrf.mxu0 }
 0x229   : > { %v659_v63 = vadd.f32 %v655_v62, %v491_v43 }
 0x22a   : > { %v1141_v0 = vpop.f32.mrf.mxu0 }
 0x22b   : > { %1267 = vtanh.f32 %v659_v63 }
 0x238   : > { %v1268_v1 = vpop.eup %1267 }
 0x239   : > { %954 = vst [vmem:[%s1706_s22 + $0x8] sm:$0xff] %v1268_v1  ;;  %663 = vst [vmem:[#allocation2] sm:$0xff] %v1268_v1  ;;  %1175 = vmatmul.mubr.f32.vlgmr.msra.gmra.mxu1 %v1268_v1 }
 0x23a   : > { %1388 = shalt.err (!%p1385_p6)
}
 0x23b   : > { %s1389_s22 = scalar_lea.hbm %s1806_s23, 256  ;;  %s1393_s26 = scalar_lea.hbm %s1901_s8, 1024 }
 0x23c   : > { %p1390_p4 = scmp.ne.s32.totalorder %s1806_s23, %s1389_s22  ;;  %p1394_p11 = scmp.lt.s32.totalorder %s1806_s23, %s1901_s8 }
 0x23d   : > { %p1395_p5 = scmp.lt.s32.totalorder %s1393_s26, %s1389_s22 }
 0x23e   : > { %p1391_p9 = pnand %p1390_p4, %p1927_p12 }
 0x23f   : > { %p1396_p7 = por %p1395_p5, %p1394_p11 }
 0x240   : > { %p1392_p3 = pneg %p1391_p9 }
 0x242   : > { %p1397_p1 = pnand %p1396_p7, %p1392_p3 }
 0x244   : > { %1400 = shalt.err (!%p1397_p1)
}
 0x245   : > { %s1488_s21 = smov 128   ;;  %s1489_s11 = smov 8   ;;  %v955_v2 = vld [vmem:[%s1899_s6] ss:$0 sm:$0xff] }
 0x246   : > { %1192 = dma.vmem_to_hbm [thread:$0]  (%p1927_p12), %s1809_s14, 256, %s1806_s23, %s772_s3, %s1488_s21, %s1488_s21, %s1489_s11  }
 0x247   : > { %s785_s16 = sshll.u32 %s1703_s13, 4  ;;  %s1847_s10 = scalar_lea.hbm %s1900_s7, %s965_s19  ;;  %s1849_s16 = int_to_ptr.vmem [resolvable:$true] %s785_s16 }
 0x248   : > { %s767_s23 = scalar_lea.sflag [#allocation6], %s1683_s2  ;;  %s1401_s14 = scalar_lea.vmem %s1849_s16, 256 }
 0x249   : > { %p1402_p10 = scmp.ne.s32.totalorder %s1849_s16, %s1401_s14  ;;  %s1490_s3 = smov [#allocation12]  }
 0x24a   : > { %s1405_s20 = sshll.u32 %s1490_s3, 4  ;;  %s1406_s20 = int_to_ptr.vmem [resolvable:$false] %s1405_s20 }
 0x24b   : > { %p1403_p13 = pnand %p1402_p10, %p1927_p12  ;;  %s1407_s9 = scalar_lea.vmem %s1406_s20, 512 }
 0x24c   : > { %p1408_p2 = scmp.lt.s32.totalorder %s1849_s16, %s1406_s20  ;;  %p1409_p8 = scmp.lt.s32.totalorder %s1407_s9, %s1401_s14 }
 0x24d   : > { %p1404_p0 = pneg %p1403_p13 }
 0x24e   : > { %p1410_p6 = por %p1409_p8, %p1408_p2 }
 0x250   : > { %p1411_p4 = pnand %p1410_p6, %p1404_p0 }
 0x2f9   : > { %v1176_v3 = vpop.f32.mrf.mxu1 }
 0x2fa   : > { %v761_v4 = vadd.f32 %v1176_v3, %v955_v2 }
 0x2fb   : > { %v755_v5 = vpop.f32.mrf.mxu1 }
 0x2fc   : > { %765 = vst [vmem:[%s1703_s13 + $0x8] sm:$0xff] %v761_v4  ;;  %v756_v6 = vadd.f32 %v955_v2, %v755_v5 }
 0x2fe   : > { %764 = vst [vmem:[%s1703_s13] sm:$0xff] %v756_v6 }
 0x2ff   : > { %1414 = shalt.err (!%p1411_p4)
}
 0x300   : > { %s1415_s13 = scalar_lea.hbm %s1847_s10, 256  ;;  %s1419_s17 = scalar_lea.hbm %s1900_s7, 1024 }
 0x301   : > { %p1416_p9 = scmp.ne.s32.totalorder %s1847_s10, %s1415_s13  ;;  %p1420_p5 = scmp.lt.s32.totalorder %s1847_s10, %s1900_s7 }
 0x302   : > { %p1421_p7 = scmp.lt.s32.totalorder %s1419_s17, %s1415_s13 }
 0x303   : > { %p1417_p3 = pnand %p1416_p9, %p1927_p12 }
 0x304   : > { %p1422_p1 = por %p1421_p7, %p1420_p5 }
 0x305   : > { %p1418_p11 = pneg %p1417_p3 }
 0x307   : > { %p1423_p10 = pnand %p1422_p1, %p1418_p11 }
 0x309   : > { %1426 = shalt.err (!%p1423_p10)
}
 0x30a   : > { %1191 = dma.vmem_to_hbm [thread:$0]  (%p1927_p12), %s1849_s16, 256, %s1847_s10, %s767_s23, %s1488_s21, %s1488_s21, %s1489_s11  }
 0x30b PF: > { %p1223_p13 = scmp.ge.s32.totalorder %s1477_s30, 2  ;;  %s816_s26 = sand.u32 1, %s1465_s27  }
 0x30c   : > { %p1928_p0 = scmp.ne.s32.totalorder %s1911_s12, 0  ;;  %s817_s14 = scalar_lea.sflag [#allocation6], %s816_s26 }
 0x30e   : > { %p1210_p2 = pnand %p1223_p13, %p1928_p0 }
 0x310   : > { %p1211_p8 = pneg %p1210_p2 }
 0x312   : > { %1456 = dma.done.wait (%p1211_p8), %s817_s14, 256  }
 0x313   : > { %1458 = vsyncadd (%p1211_p8), %s817_s14, 4294967040  ;;  %s826_s3 = scalar_lea.sflag [#allocation14], %s816_s26 }
 0x314   : > { %1460 = dma.done.wait (%p1211_p8), %s826_s3, 256  }
 0x315   : > { %1462 = vsyncadd (%p1211_p8), %s826_s3, 4294967040  ;;  %p27_p12 = scmp.ge.s32.totalorder %s1625_s18, 6   ;;  %s1929_s27 = smov %s1469_s28 }
 0x316   : > { %s1930_s28 = smov %s1473_s29  ;;  %s1931_s29 = smov %s1635_s24 }
 0x317   : > { %s1932_s30 = smov %s1625_s18  ;;  %29 = sbr.rel (!%p27_p12) target bundleno = 12 (0xc), region = 128 }
 0x31c   :  { %831 = vsyncpa [#allocation5], 1 }
 0x31d   :  { %833 = vsyncpa [#allocation5 + $0x1], 1 }
 0x31e   :  { %834 = vsyncpa [#allocation8], 1 }
 0x31f   :  { %835 = vsyncpa [#allocation11], 1 }
 0x320   :  { %836 = vsyncpa [#allocation6], 1 }
 0x321   :  { %838 = vsyncpa [#allocation6 + $0x1], 1 }
 0x322   :  { %839 = vsyncpa [#allocation14], 1 }
 0x323   :  { %841 = vsyncpa [#allocation14 + $0x1], 1 }

</bundles_post_ra>
